<compile_context>
chip_gen: v7x
topology: tpu7x:2x2x1
jax: 0.10.0
libtpu: 0.0.40
codegen_flags: <defaults>
</compile_context>

<pallas_src>
import math

import jax
import jax.numpy as jnp
from jax.experimental import pallas as pl
from jax.experimental.pallas import tpu as pltpu


# ----------------------------- Pallas kernel ------------------------------ #
def _linear_kernel(x_ref, w_ref, b_ref, o_ref, acc_ref):
    # x: (tm, tk) bf16 ; w: (tk, tn) bf16 ; b: (1, tn) f32 ; o: (tm, tn)
    k = pl.program_id(2)

    @pl.when(k == 0)
    def _():
        acc_ref[...] = jnp.zeros_like(acc_ref)

    acc_ref[...] += jnp.dot(
        x_ref[...], w_ref[...], preferred_element_type=jnp.float32
    )

    @pl.when(k == pl.num_programs(2) - 1)
    def _():
        o_ref[...] = (acc_ref[...] + b_ref[...]).astype(o_ref.dtype)


def _round_up(x, m):
    return ((x + m - 1) // m) * m


def pallas_linear(x2d, w, b, *, tm=256, tn=256, tk=256):
    """x2d: (M, K); w: (K, N); b: (1, N)  ->  (M, N) in x2d.dtype.

    Tiled K-reduction matmul.  Inputs are cast to bf16 for the MXU; the
    accumulation is float32.  Arrays are zero-padded to tile multiples (the
    padded region contributes zeros to the dot) and the result is sliced back.
    Default 256-aligned tiles match the v6e/v7x 256x256 MXU; they shrink
    automatically for small problems while staying lane-dense (N mult. of 128)
    and (8,128)/bf16-packing legal.  VMEM use at 256 tiles is ~1.3 MiB, well
    under the scoped default on v5e/v6e/v7x.
    """
    M, K = x2d.shape
    K2, N = w.shape
    assert K == K2
    out_dtype = x2d.dtype

    tm = min(tm, _round_up(M, 16))
    tn = min(tn, _round_up(N, 128))
    tk = min(tk, _round_up(K, 128))

    Mp, Kp, Np = _round_up(M, tm), _round_up(K, tk), _round_up(N, tn)

    xb = jnp.pad(x2d.astype(jnp.bfloat16), ((0, Mp - M), (0, Kp - K)))
    wb = jnp.pad(w.astype(jnp.bfloat16), ((0, Kp - K), (0, Np - N)))
    bb = jnp.pad(b.astype(jnp.float32), ((0, 0), (0, Np - N)))

    grid = (Mp // tm, Np // tn, Kp // tk)

    out = pl.pallas_call(
        _linear_kernel,
        out_shape=jax.ShapeDtypeStruct((Mp, Np), out_dtype),
        grid_spec=pltpu.PrefetchScalarGridSpec(
            num_scalar_prefetch=0,
            grid=grid,
            in_specs=[
                pl.BlockSpec((tm, tk), lambda i, j, k: (i, k)),
                pl.BlockSpec((tk, tn), lambda i, j, k: (k, j)),
                pl.BlockSpec((1, tn), lambda i, j, k: (0, j)),
            ],
            out_specs=pl.BlockSpec((tm, tn), lambda i, j, k: (i, j)),
            scratch_shapes=[pltpu.VMEM((tm, tn), jnp.float32)],
        ),
        compiler_params=pltpu.CompilerParams(
            dimension_semantics=("parallel", "parallel", "arbitrary"),
        ),
    )(xb, wb, bb)
    return out[:M, :N]


# ------------------------- AttrTensor + NoMeta glue ------------------------ #
class AttrTensor:
    """Minimal AttrTensor: raw data plus attribute metadata."""

    def __init__(self, data, lengths=None, word_probs=None, pc=None):
        self.data = data
        self.lengths = lengths
        self.word_probs = word_probs
        self.pc = pc

    @classmethod
    def from_old_metadata(cls, data, old):
        return cls(data, old.lengths, old.word_probs, old.pc)


class NoMeta:
    """Wrapper module: unwrap AttrTensor args, run the contained module, and
    re-wrap the result with the first argument's metadata (if it had any)."""

    def __init__(self, module):
        self.module = module

    def __call__(self, *args):
        module_args = [a.data if isinstance(a, AttrTensor) else a for a in args]
        result = self.module(*module_args)
        if isinstance(args[0], AttrTensor):
            return AttrTensor.from_old_metadata(result, args[0])
        return result
    # TODO(synk): nn.Module parameter registration / autograd hooks are
    # PyTorch framework features with no Pallas equivalent; omitted.


class PallasLinear:
    """Contained module for the demo: Linear whose matmul runs in Pallas."""

    def __init__(self, input_size, output_size, key=jax.random.PRNGKey(42)):
        in_f, out_f = int(input_size), int(output_size)
        kw, kb = jax.random.split(key)
        bound = 1.0 / math.sqrt(in_f)
        self.weight = jax.random.uniform(
            kw, (in_f, out_f), jnp.float32, -bound, bound)   # stored (K, N)
        self.bias = jax.random.uniform(
            kb, (1, out_f), jnp.float32, -bound, bound)

    def __call__(self, x):
        lead = x.shape[:-1]
        x2d = x.reshape((-1, x.shape[-1]))
        out2d = pallas_linear(x2d, self.weight, self.bias)
        return out2d.reshape(lead + (self.weight.shape[1],))


# --------------------------------- main ------------------------------------ #
if __name__ == "__main__":
    batch, seq, hidden, out_features = 2, 8, 32, 32
    key = jax.random.PRNGKey(0)
    x = jax.random.normal(key, (batch, seq, hidden), dtype=jnp.float32)
    lengths = jnp.full((batch,), seq, dtype=jnp.int32)

    inner = PallasLinear(hidden, out_features)
    mod = NoMeta(inner)

    # AttrTensor path: data is unwrapped, result is re-wrapped with metadata.
    at_in = AttrTensor(x, lengths=lengths)
    at_out = mod(at_in)
    y = jax.block_until_ready(at_out.data)
    assert isinstance(at_out, AttrTensor)
    assert at_out.lengths is lengths
    assert y.shape == (batch, seq, out_features)

    # Plain-tensor path: result is returned unwrapped.
    y_plain = jax.block_until_ready(mod(x))
    assert not isinstance(y_plain, AttrTensor)

    # Numerical check vs a plain JAX reference using the same bf16-input /
    # f32-accumulate math as the kernel.
    x2d = x.reshape(-1, hidden)
    ref = jnp.dot(x2d.astype(jnp.bfloat16), inner.weight.astype(jnp.bfloat16),
                  preferred_element_type=jnp.float32) + inner.bias
    ref = ref.reshape(batch, seq, out_features)
    assert jnp.allclose(y, ref, atol=1e-2, rtol=1e-2)
    assert jnp.allclose(y_plain, ref, atol=1e-2, rtol=1e-2)

    print("KERNEL_OK")
</pallas_src>

<mosaic_0001>
module attributes {stable_mosaic.version = 11 : i64} {
  func.func @_linear_kernel(%arg0: i32, %arg1: i32, %arg2: i32, %arg3: memref<16x128xbf16, #tpu.memory_space<vmem>>, %arg4: memref<128x128xbf16, #tpu.memory_space<vmem>>, %arg5: memref<1x128xf32, #tpu.memory_space<vmem>>, %arg6: memref<16x128xf32, #tpu.memory_space<vmem>>, %arg7: memref<16x128xf32, #tpu.memory_space<vmem>>) attributes {dimension_semantics = [#tpu.dimension_semantics<parallel>, #tpu.dimension_semantics<parallel>, #tpu.dimension_semantics<arbitrary>], iteration_bounds = array<i64: 1, 1, 1>, scalar_prefetch = 0 : i64, scratch_operands = 1 : i64, tpu.core_type = #tpu.core_type<tc>, window_params = [{transform_indices = @transform_0, window_bounds = array<i64: 16, 128>}, {transform_indices = @transform_1, window_bounds = array<i64: 128, 128>}, {transform_indices = @transform_2, window_bounds = array<i64: 1, 128>}, {transform_indices = @transform_3, window_bounds = array<i64: 16, 128>}]} {
    %c0_i32 = arith.constant 0 : i32
    %0 = arith.cmpi eq, %arg2, %c0_i32 : i32
    %1 = arith.extui %0 : i1 to i32
    %c0_i32_0 = arith.constant 0 : i32
    %2 = arith.cmpi ne, %1, %c0_i32_0 : i32
    scf.if %2 {
      %cst_10 = arith.constant 0.000000e+00 : f32
      %12 = vector.broadcast %cst_10 : f32 to vector<16x128xf32>
      %c0_11 = arith.constant 0 : index
      %c0_12 = arith.constant 0 : index
      %13 = vector.load %arg7[%c0_11, %c0_12] : memref<16x128xf32, #tpu.memory_space<vmem>>, vector<16x128xf32>
      tpu.vector_store %arg7[%c0_11, %c0_12], %12 {strides = array<i32>} : memref<16x128xf32, #tpu.memory_space<vmem>>, vector<16x128xf32>,
    } else {
    }
    %c0 = arith.constant 0 : index
    %c0_1 = arith.constant 0 : index
    %3 = vector.load %arg7[%c0, %c0_1] : memref<16x128xf32, #tpu.memory_space<vmem>>, vector<16x128xf32>
    %c0_2 = arith.constant 0 : index
    %c0_3 = arith.constant 0 : index
    %4 = vector.load %arg3[%c0_2, %c0_3] : memref<16x128xbf16, #tpu.memory_space<vmem>>, vector<16x128xbf16>
    %c0_4 = arith.constant 0 : index
    %c0_5 = arith.constant 0 : index
    %5 = vector.load %arg4[%c0_4, %c0_5] : memref<128x128xbf16, #tpu.memory_space<vmem>>, vector<128x128xbf16>
    %cst = arith.constant dense<0.000000e+00> : vector<16x128xf32>
    %6 = tpu.matmul %4, %5, %cst {dimension_numbers = #tpu.dot_dimension_numbers<[1], [0], [0], [1], [0, 0, 1, 1], [], []>} : vector<16x128xbf16>, vector<128x128xbf16>, vector<16x128xf32> -> vector<16x128xf32>
    %7 = arith.addf %3, %6 : vector<16x128xf32>
    %c0_6 = arith.constant 0 : index
    %c0_7 = arith.constant 0 : index
    %8 = vector.load %arg7[%c0_6, %c0_7] : memref<16x128xf32, #tpu.memory_space<vmem>>, vector<16x128xf32>
    tpu.vector_store %arg7[%c0_6, %c0_7], %7 {strides = array<i32>} : memref<16x128xf32, #tpu.memory_space<vmem>>, vector<16x128xf32>,
    %c0_i32_8 = arith.constant 0 : i32
    %9 = arith.cmpi eq, %arg2, %c0_i32_8 : i32
    %10 = arith.extui %9 : i1 to i32
    %c0_i32_9 = arith.constant 0 : i32
    %11 = arith.cmpi ne, %10, %c0_i32_9 : i32
    scf.if %11 {
      %c0_10 = arith.constant 0 : index
      %c0_11 = arith.constant 0 : index
      %12 = vector.load %arg7[%c0_10, %c0_11] : memref<16x128xf32, #tpu.memory_space<vmem>>, vector<16x128xf32>
      %c0_12 = arith.constant 0 : index
      %c0_13 = arith.constant 0 : index
      %13 = vector.load %arg5[%c0_12, %c0_13] : memref<1x128xf32, #tpu.memory_space<vmem>>, vector<1x128xf32>
      %14 = vector.broadcast %13 : vector<1x128xf32> to vector<16x128xf32>
      %15 = arith.addf %12, %14 : vector<16x128xf32>
      %c0_14 = arith.constant 0 : index
      %c0_15 = arith.constant 0 : index
      %16 = vector.load %arg6[%c0_14, %c0_15] : memref<16x128xf32, #tpu.memory_space<vmem>>, vector<16x128xf32>
      tpu.vector_store %arg6[%c0_14, %c0_15], %15 {strides = array<i32>} : memref<16x128xf32, #tpu.memory_space<vmem>>, vector<16x128xf32>,
    } else {
    }
    return
  }
  func.func @transform_0(%arg0: i32, %arg1: i32, %arg2: i32) -> (i32, i32) {
    %c0_i32 = arith.constant 0 : i32
    return %arg0, %arg2 : i32, i32
  }
  func.func @transform_1(%arg0: i32, %arg1: i32, %arg2: i32) -> (i32, i32) {
    %c0_i32 = arith.constant 0 : i32
    return %arg2, %arg1 : i32, i32
  }
  func.func @transform_2(%arg0: i32, %arg1: i32, %arg2: i32) -> (i32, i32) {
    %c0_i32 = arith.constant 0 : i32
    %c0_i32_0 = arith.constant 0 : i32
    return %c0_i32, %arg1 : i32, i32
  }
  func.func @transform_3(%arg0: i32, %arg1: i32, %arg2: i32) -> (i32, i32) {
    %c0_i32 = arith.constant 0 : i32
    return %arg0, %arg1 : i32, i32
  }
}

</mosaic_0001>

<bundles_post_ra>
// kernel: tpu_custom_call.1
= control target key start
LH: loop header
LB: loop body
LE: loop exit
PB: predicated region body
PF: predicated region fallthrough
CT: control target
= control target key end

     0   :  { %8 = vsyncpa [#allocation4], 0  ;;  %s400_s0 = inlined_call_operand.hbm [shape: bf16[16,128], index: 0, kind: input, shape index: {}]   ;;  %s401_s1 = inlined_call_operand.hbm [shape: bf16[128,128], index: 1, kind: input, shape index: {}]   ;;  %s402_s2 = inlined_call_operand.vmem [shape: f32[1,128], index: 2, kind: input, shape index: {}]   ;;  %s403_s3 = inlined_call_operand.hbm [shape: f32[16,128], index: 3, kind: output, shape index: {}]  }
   0x1   :  { %9 = vsyncpa [#allocation7], 0 }
   0x2   :  { %10 = vsyncpa [#allocation5], 0  ;;  %s332_s12 = smov [#allocation3]   ;;  %s260_s16 = scalar_lea.hbm %s400_s0, 128 }
   0x3   :  { %s16_s13 = sshll.u32 %s332_s12, 4  ;;  %p261_p0 = scmp.ne.s32.totalorder %s400_s0, %s260_s16  ;;  %s17_s13 = int_to_ptr.vmem [resolvable:$true] %s16_s13 }
   0x4   :  { %p264_p1 = scmp.lt.u32.totalorder %s260_s16, %s400_s0 }
   0x6   :  { %p266_p2 = pnand %p264_p1, %p261_p0 }
   0x8   :  { %269 = shalt.err (!%p266_p2)
}
   0x9   :  { %s270_s21 = scalar_lea.vmem %s17_s13, 128  ;;  %p275_p4 = scmp.lt.s32.totalorder %s17_s13, %s17_s13 }
   0xa   :  { %p271_p3 = scmp.ne.s32.totalorder %s17_s13, %s270_s21  ;;  %p276_p5 = scmp.lt.s32.totalorder %s270_s21, %s270_s21 }
   0xc   :  { %p277_p6 = por %p276_p5, %p275_p4 }
   0xe   :  { %p278_p7 = pnand %p277_p6, %p271_p3 }
  0x10   :  { %281 = shalt.err (!%p278_p7)
}
  0x11   :  { %s333_s22 = smov 64   ;;  %s334_s23 = smov 4  }
  0x12   :  { %22 = dma.hbm_to_vmem [thread:$0]  %s400_s0, 128, %s17_s13, [#allocation4], %s333_s22, %s333_s22, %s334_s23  }
  0x13   :  { %s335_s26 = smov [#allocation6]   ;;  %s282_s30 = scalar_lea.hbm %s401_s1, 1024 }
  0x14   :  { %s28_s27 = sshll.u32 %s335_s26, 4  ;;  %p283_p8 = scmp.ne.s32.totalorder %s401_s1, %s282_s30  ;;  %s29_s27 = int_to_ptr.vmem [resolvable:$true] %s28_s27 }
  0x15   :  { %p286_p9 = scmp.lt.u32.totalorder %s282_s30, %s401_s1 }
  0x17   :  { %p288_p10 = pnand %p286_p9, %p283_p8 }
  0x19   :  { %291 = shalt.err (!%p288_p10)
}
  0x1a   :  { %s292_s8 = scalar_lea.vmem %s29_s27, 1024  ;;  %p297_p12 = scmp.lt.s32.totalorder %s29_s27, %s29_s27 }
  0x1b   :  { %p293_p11 = scmp.ne.s32.totalorder %s29_s27, %s292_s8  ;;  %p298_p13 = scmp.lt.s32.totalorder %s292_s8, %s292_s8 }
  0x1d   :  { %p299_p0 = por %p298_p13, %p297_p12 }
  0x1f   :  { %p300_p1 = pnand %p299_p0, %p293_p11 }
  0x21   :  { %303 = shalt.err (!%p300_p1)
}
  0x22   :  { %34 = dma.hbm_to_vmem [thread:$0]  %s401_s1, 1024, %s29_s27, [#allocation7], %s333_s22, %s333_s22, %s334_s23  }
  0x23   :  { %326 = dma.done.wait [#allocation4], 128  }
  0x24   :  { %327 = vsyncadd [#allocation4], 4294967168 }
  0x25   :  { %328 = dma.done.wait [#allocation7], 1024  }
  0x26   :  { %329 = vsyncadd [#allocation7], 4294966272  ;;  %v336_v0 = vmov 0.0   ;;  %vm337_vm0 = vmmov 0   ;;  %v251_v1 = vld [vmem:[#allocation6] sm:$0xff]   ;;  %v252_v2 = vld [vmem:[#allocation6 + $0x8] sm:$0xff]  }
  0x27   :  { %222 = vmatprep.subr.bf16.mxu0 %v336_v0  ;;  %238 = vmatprep.mubr.msk.bf16.mxu0 %vm337_vm0, %v336_v0  ;;  %v253_v3 = vld [vmem:[#allocation6 + $0x10] sm:$0xff]   ;;  %v254_v4 = vld [vmem:[#allocation6 + $0x18] sm:$0xff]   ;;  %v255_v5 = vld [vmem:[#allocation6 + $0x20] sm:$0xff]   ;;  %s338_s11 = smov [#allocation8]  }
  0x28   :  { %223 = vmatpush3.bf16.msra.mxu0 %v251_v1  ;;  %v256_v6 = vld [vmem:[#allocation6 + $0x28] sm:$0xff]   ;;  %v257_v7 = vld [vmem:[#allocation6 + $0x30] sm:$0xff]   ;;  %v258_v8 = vld [vmem:[#allocation6 + $0x38] sm:$0xff]   ;;  %s190_s12 = sshll.u32 %s338_s11, 4  ;;  %s191_s12 = int_to_ptr.vmem [resolvable:$true] %s190_s12 }
  0x29   :  { %224 = vmatprep.subr.bf16.mxu0 %v336_v0  ;;  %v259_v9 = vld [vmem:[#allocation3] sm:$0xff]   ;;  %s304_s13 = scalar_lea.vmem %s191_s12, 256  ;;  %p309_p3 = scmp.lt.s32.totalorder %s191_s12, %s191_s12 }
  0x2a   :  { %v212_v10 = vld [vmem:[%s402_s2] ss:$0 sm:$0xff]  ;;  %p305_p2 = scmp.ne.s32.totalorder %s191_s12, %s304_s13  ;;  %p310_p4 = scmp.lt.s32.totalorder %s304_s13, %s304_s13 }
  0x2c   :  { %225 = vmatpush3.bf16.msra.mxu0 %v252_v2  ;;  %p311_p5 = por %p310_p4, %p309_p3 }
  0x2d   :  { %226 = vmatprep.subr.bf16.mxu0 %v336_v0 }
  0x2e   :  { %p312_p6 = pnand %p311_p5, %p305_p2 }
  0x30   :  { %227 = vmatpush3.bf16.msra.mxu0 %v253_v3 }
  0x31   :  { %228 = vmatprep.subr.bf16.mxu0 %v336_v0 }
  0x34   :  { %229 = vmatpush3.bf16.msra.mxu0 %v254_v4 }
  0x35   :  { %230 = vmatprep.subr.bf16.mxu0 %v336_v0 }
  0x38   :  { %231 = vmatpush3.bf16.msra.mxu0 %v255_v5 }
  0x39   :  { %232 = vmatprep.subr.bf16.mxu0 %v336_v0 }
  0x3c   :  { %233 = vmatpush3.bf16.msra.mxu0 %v256_v6 }
  0x3d   :  { %234 = vmatprep.subr.bf16.mxu0 %v336_v0 }
  0x40   :  { %235 = vmatpush3.bf16.msra.mxu0 %v257_v7 }
  0x41   :  { %236 = vmatprep.subr.bf16.mxu0 %v336_v0 }
  0x44   :  { %237 = vmatpush3.bf16.msra.mxu0 %v258_v8 }
  0x47   :  { %239 = vmatmul.mubr.bf16.vlgmr.msra.gmra.mrb[0].mxu0 %v259_v9 }
 0x11a   :  { %v158_v11 = vpop.f32.mrb[0].mxu0 }
 0x11b   :  { %v181_v12 = vadd.f32 %v212_v10, %v158_v11  ;;  %v240_v13 = vpop.f32.mrb[1].mxu0 }
 0x11c   :  { %v161_v14 = vpop.f32.mrb[2].mxu0 }
 0x11d   :  { %183 = vst [vmem:[#allocation8] sm:$0xff] %v181_v12  ;;  %v182_v15 = vadd.f32 %v212_v10, %v161_v14  ;;  %v241_v16 = vpop.f32.mrb[3].mxu0 }
 0x11f   :  { %184 = vst [vmem:[#allocation8 + $0x8] sm:$0xff] %v182_v15 }
 0x120   :  { %315 = shalt.err (!%p312_p6)
}
 0x121   :  { %s316_s15 = scalar_lea.hbm %s403_s3, 256 }
 0x122   :  { %p317_p7 = scmp.ne.s32.totalorder %s403_s3, %s316_s15  ;;  %p320_p8 = scmp.lt.u32.totalorder %s316_s15, %s403_s3 }
 0x124   :  { %p322_p9 = pnand %p320_p8, %p317_p7 }
 0x126   :  { %325 = shalt.err (!%p322_p9)
}
 0x127   :  { %s339_s20 = smov 128   ;;  %s340_s21 = smov 8  }
 0x128   :  { %196 = dma.vmem_to_hbm [thread:$0]  %s191_s12, 256, %s403_s3, [#allocation5], %s339_s20, %s339_s20, %s340_s21  }
 0x129   :  { %330 = dma.done.wait [#allocation5], 256  }
 0x12a   :  { %331 = vsyncadd [#allocation5], 4294967040 }
 0x12b   :  { %200 = vsyncpa [#allocation4], 1 }
 0x12c   :  { %201 = vsyncpa [#allocation7], 1 }
 0x12d   :  { %202 = vsyncpa [#allocation5], 1 }

</bundles_post_ra>
